<compile_context>
chip_gen: v7x
topology: tpu7x:2x2x1
jax: 0.10.0
libtpu: 0.0.40
codegen_flags: <defaults>
</compile_context>

<pallas_src>
import jax
import jax.numpy as jnp
from jax.experimental import pallas as pl
from jax.experimental.pallas import tpu as pltpu


def classifier_head_kernel(x_ref, w1_ref, b1_ref, w2_ref, b2_ref, o_ref):
    # In-kernel cast of the activation tile (no extra HBM pass in the wrapper).
    x = x_ref[...].astype(w1_ref.dtype)
    # First linear (MXU, f32 accumulation) + bias + ReLU in f32.
    h = jnp.dot(x, w1_ref[...], preferred_element_type=jnp.float32)
    h = jnp.maximum(h + b1_ref[...], 0.0)
    # Dropout(0.3): identity in eval mode (no-op).
    # Second linear: cast activations to the weight compute dtype, f32 accumulate.
    out = jnp.dot(h.astype(w2_ref.dtype), w2_ref[...],
                  preferred_element_type=jnp.float32)
    o_ref[...] = (out + b2_ref[...]).astype(o_ref.dtype)


def _round_up(n, m):
    return ((n + m - 1) // m) * m


def classifier_head(x, w1, b1, w2, b2, *,
                    compute_dtype=jnp.bfloat16, out_dtype=None, tile_b=2048):
    """x: (B, in_dim); w1: (in_dim, 64); b1: (1, 64); w2: (64, C); b2: (1, C)."""
    B, in_dim = x.shape
    hidden, C = w2.shape
    if out_dtype is None:
        out_dtype = compute_dtype

    # Lane-dense hidden and output dims (pad sliced off / numerically inert).
    H_pad = _round_up(hidden, 128)
    C_pad = _round_up(C, 128)

    # Tiny-weight prep (O(in_dim*hidden), independent of B).  Padded w1 columns and
    # w2 rows are zero, so padded h lanes contribute exactly zero to the output.
    w1c = jnp.pad(w1.astype(compute_dtype), ((0, 0), (0, H_pad - hidden)))
    b1f = jnp.pad(b1.astype(jnp.float32), ((0, 0), (0, H_pad - hidden)))
    w2c = jnp.pad(w2.astype(compute_dtype), ((0, H_pad - hidden), (0, C_pad - C)))
    b2f = jnp.pad(b2.astype(jnp.float32), ((0, 0), (0, C_pad - C)))

    # --- Batch tile sizing -------------------------------------------------
    TILE_B = max(8, min(_round_up(tile_b, 8), _round_up(B, 8)))
    # v7x megacore: if B can support it, ensure at least 2 parallel grid steps.
    if B >= 16 and pl.cdiv(B, TILE_B) < 2:
        TILE_B = _round_up(pl.cdiv(B, 2), 8)

    x_bytes = jnp.dtype(x.dtype).itemsize
    o_bytes = jnp.dtype(out_dtype).itemsize
    c_bytes = jnp.dtype(compute_dtype).itemsize

    weight_bytes = 2 * (in_dim * H_pad * c_bytes + H_pad * C_pad * c_bytes
                        + (H_pad + C_pad) * 4)

    def _tile_vmem_bytes(tb):
        # double-buffered x + out tiles, plus in-kernel temporaries (bf16 x copy,
        # f32 h, bf16 h, f32 pre-cast out).
        return (2 * tb * in_dim * x_bytes
                + 2 * tb * C_pad * o_bytes
                + tb * (in_dim * c_bytes + H_pad * (4 + c_bytes) + C_pad * 4))

    # Conservative budget: fits v7x's 64 MiB physical VMEM per TC with headroom
    # (v5e/v6e have 128 MiB, so this never over-constrains correctness there).
    VMEM_BUDGET = 44 * 1024 * 1024
    while TILE_B > 8 and _tile_vmem_bytes(TILE_B) + weight_bytes > VMEM_BUDGET:
        TILE_B = max(8, _round_up(TILE_B // 2, 8))

    grid = (pl.cdiv(B, TILE_B),)

    needed = _tile_vmem_bytes(TILE_B) + weight_bytes
    vmem_limit = int(min(60 * 1024 * 1024,
                         max(32 * 1024 * 1024, needed * 5 // 4)))

    flops = 2 * B * in_dim * H_pad + 2 * B * H_pad * C_pad
    bytes_accessed = int(B * in_dim * x_bytes            # x read once
                         + B * C_pad * o_bytes           # output stores
                         + in_dim * H_pad * c_bytes      # w1
                         + H_pad * C_pad * c_bytes       # w2
                         + (H_pad + C_pad) * 4)          # biases

    out = pl.pallas_call(
        classifier_head_kernel,
        out_shape=jax.ShapeDtypeStruct((B, C_pad), out_dtype),
        grid=grid,
        in_specs=[
            pl.BlockSpec((TILE_B, in_dim), lambda i: (i, 0)),   # x: batch-tiled
            pl.BlockSpec((in_dim, H_pad), lambda i: (0, 0)),    # w1: VMEM-resident
            pl.BlockSpec((1, H_pad), lambda i: (0, 0)),         # b1: resident
            pl.BlockSpec((H_pad, C_pad), lambda i: (0, 0)),     # w2: resident
            pl.BlockSpec((1, C_pad), lambda i: (0, 0)),         # b2: resident
        ],
        out_specs=pl.BlockSpec((TILE_B, C_pad), lambda i: (i, 0)),
        compiler_params=pltpu.CompilerParams(
            dimension_semantics=("parallel",),
            vmem_limit_bytes=vmem_limit),
        cost_estimate=pl.CostEstimate(
            flops=flops, transcendentals=0, bytes_accessed=bytes_accessed),
    )(x, w1c, b1f, w2c, b2f)

    # Strip class-lane padding (ragged batch tail was never stored).
    return out[:, :C]


def init_params(key, in_dim=128, hidden=64, num_classes=10, dtype=jnp.float32):
    # Deterministic PyTorch-style uniform(-1/sqrt(fan_in), 1/sqrt(fan_in)) init.
    k1, k2, k3, k4 = jax.random.split(key, 4)
    bound1 = 1.0 / (in_dim ** 0.5)
    bound2 = 1.0 / (hidden ** 0.5)
    w1 = jax.random.uniform(k1, (in_dim, hidden), dtype, -bound1, bound1)
    b1 = jax.random.uniform(k2, (1, hidden), dtype, -bound1, bound1)
    w2 = jax.random.uniform(k3, (hidden, num_classes), dtype, -bound2, bound2)
    b2 = jax.random.uniform(k4, (1, num_classes), dtype, -bound2, bound2)
    return w1, b1, w2, b2


if __name__ == "__main__":
    key = jax.random.PRNGKey(0)
    kx, kp = jax.random.split(key)

    B, in_dim, num_classes = 2, 128, 10
    x = jax.random.normal(kx, (B, in_dim), jnp.float32)
    w1, b1, w2, b2 = init_params(kp, in_dim=in_dim, num_classes=num_classes)

    # Pure-JAX reference (eval-mode dropout = identity), f32.
    ref = jnp.maximum(x @ w1 + b1, 0.0) @ w2 + b2

    # f32 compute/output path: tight agreement with the reference.
    out_f32 = classifier_head(x, w1, b1, w2, b2,
                              compute_dtype=jnp.float32, out_dtype=jnp.float32)
    out_f32 = jax.block_until_ready(out_f32)
    assert out_f32.shape == (B, num_classes)
    assert jnp.allclose(out_f32, ref, atol=1e-5, rtol=1e-5)

    # Default bf16 compute + bf16 output path (HBM/MXU-optimized): loose tolerance.
    out_bf16 = classifier_head(x, w1, b1, w2, b2)
    out_bf16 = jax.block_until_ready(out_bf16)
    assert out_bf16.shape == (B, num_classes)
    assert jnp.allclose(out_bf16.astype(jnp.float32), ref, atol=5e-2, rtol=5e-2)

    # Multi-tile grid with a ragged batch tail (exercises edge-block masking).
    B2 = 300
    x2 = jax.random.normal(jax.random.PRNGKey(1), (B2, in_dim), jnp.float32)
    ref2 = jnp.maximum(x2 @ w1 + b1, 0.0) @ w2 + b2
    out2 = classifier_head(x2, w1, b1, w2, b2,
                           compute_dtype=jnp.float32, out_dtype=jnp.float32,
                           tile_b=128)
    out2 = jax.block_until_ready(out2)
    assert out2.shape == (B2, num_classes)
    assert jnp.allclose(out2, ref2, atol=1e-4, rtol=1e-4)

    print("KERNEL_OK")
</pallas_src>

<mosaic_0001>
module attributes {stable_mosaic.version = 11 : i64} {
  func.func @classifier_head_kernel(%arg0: i32, %arg1: memref<8x128xf32, #tpu.memory_space<vmem>>, %arg2: memref<128x128xf32, #tpu.memory_space<vmem>>, %arg3: memref<1x128xf32, #tpu.memory_space<vmem>>, %arg4: memref<128x128xf32, #tpu.memory_space<vmem>>, %arg5: memref<1x128xf32, #tpu.memory_space<vmem>>, %arg6: memref<8x128xf32, #tpu.memory_space<vmem>>) attributes {dimension_semantics = [#tpu.dimension_semantics<parallel>], iteration_bounds = array<i64: 1>, scalar_prefetch = 0 : i64, scratch_operands = 0 : i64, tpu.core_type = #tpu.core_type<tc>, window_params = [{transform_indices = @transform_0, window_bounds = array<i64: 8, 128>}, {pipeline_mode = #tpu.pipeline_mode<synchronous>, transform_indices = @transform_1, window_bounds = array<i64: 128, 128>}, {pipeline_mode = #tpu.pipeline_mode<synchronous>, transform_indices = @transform_2, window_bounds = array<i64: 1, 128>}, {pipeline_mode = #tpu.pipeline_mode<synchronous>, transform_indices = @transform_3, window_bounds = array<i64: 128, 128>}, {pipeline_mode = #tpu.pipeline_mode<synchronous>, transform_indices = @transform_4, window_bounds = array<i64: 1, 128>}, {transform_indices = @transform_5, window_bounds = array<i64: 8, 128>}]} {
    %c0 = arith.constant 0 : index
    %c0_0 = arith.constant 0 : index
    %0 = vector.load %arg1[%c0, %c0_0] : memref<8x128xf32, #tpu.memory_space<vmem>>, vector<8x128xf32>
    %c0_1 = arith.constant 0 : index
    %c0_2 = arith.constant 0 : index
    %1 = vector.load %arg2[%c0_1, %c0_2] : memref<128x128xf32, #tpu.memory_space<vmem>>, vector<128x128xf32>
    %cst = arith.constant dense<0.000000e+00> : vector<8x128xf32>
    %2 = tpu.matmul %0, %1, %cst {dimension_numbers = #tpu.dot_dimension_numbers<[1], [0], [0], [1], [0, 0, 1, 1], [], []>} : vector<8x128xf32>, vector<128x128xf32>, vector<8x128xf32> -> vector<8x128xf32>
    %c0_3 = arith.constant 0 : index
    %c0_4 = arith.constant 0 : index
    %3 = vector.load %arg3[%c0_3, %c0_4] : memref<1x128xf32, #tpu.memory_space<vmem>>, vector<1x128xf32>
    %4 = vector.broadcast %3 : vector<1x128xf32> to vector<8x128xf32>
    %5 = arith.addf %2, %4 : vector<8x128xf32>
    %cst_5 = arith.constant 0.000000e+00 : f32
    %6 = vector.broadcast %cst_5 : f32 to vector<8x128xf32>
    %7 = arith.maximumf %5, %6 : vector<8x128xf32>
    %c0_6 = arith.constant 0 : index
    %c0_7 = arith.constant 0 : index
    %8 = vector.load %arg4[%c0_6, %c0_7] : memref<128x128xf32, #tpu.memory_space<vmem>>, vector<128x128xf32>
    %cst_8 = arith.constant dense<0.000000e+00> : vector<8x128xf32>
    %9 = tpu.matmul %7, %8, %cst_8 {dimension_numbers = #tpu.dot_dimension_numbers<[1], [0], [0], [1], [0, 0, 1, 1], [], []>} : vector<8x128xf32>, vector<128x128xf32>, vector<8x128xf32> -> vector<8x128xf32>
    %c0_9 = arith.constant 0 : index
    %c0_10 = arith.constant 0 : index
    %10 = vector.load %arg5[%c0_9, %c0_10] : memref<1x128xf32, #tpu.memory_space<vmem>>, vector<1x128xf32>
    %11 = vector.broadcast %10 : vector<1x128xf32> to vector<8x128xf32>
    %12 = arith.addf %9, %11 : vector<8x128xf32>
    %c0_11 = arith.constant 0 : index
    %c0_12 = arith.constant 0 : index
    %13 = vector.load %arg6[%c0_11, %c0_12] : memref<8x128xf32, #tpu.memory_space<vmem>>, vector<8x128xf32>
    tpu.vector_store %arg6[%c0_11, %c0_12], %12 {strides = array<i32>} : memref<8x128xf32, #tpu.memory_space<vmem>>, vector<8x128xf32>,
    return
  }
  func.func @transform_0(%arg0: i32) -> (i32, i32) {
    %c0_i32 = arith.constant 0 : i32
    %c0_i32_0 = arith.constant 0 : i32
    return %arg0, %c0_i32 : i32, i32
  }
  func.func @transform_1(%arg0: i32) -> (i32, i32) {
    %c0_i32 = arith.constant 0 : i32
    %c0_i32_0 = arith.constant 0 : i32
    %c0_i32_1 = arith.constant 0 : i32
    return %c0_i32, %c0_i32_0 : i32, i32
  }
  func.func @transform_2(%arg0: i32) -> (i32, i32) {
    %c0_i32 = arith.constant 0 : i32
    %c0_i32_0 = arith.constant 0 : i32
    %c0_i32_1 = arith.constant 0 : i32
    return %c0_i32, %c0_i32_0 : i32, i32
  }
  func.func @transform_3(%arg0: i32) -> (i32, i32) {
    %c0_i32 = arith.constant 0 : i32
    %c0_i32_0 = arith.constant 0 : i32
    %c0_i32_1 = arith.constant 0 : i32
    return %c0_i32, %c0_i32_0 : i32, i32
  }
  func.func @transform_4(%arg0: i32) -> (i32, i32) {
    %c0_i32 = arith.constant 0 : i32
    %c0_i32_0 = arith.constant 0 : i32
    %c0_i32_1 = arith.constant 0 : i32
    return %c0_i32, %c0_i32_0 : i32, i32
  }
  func.func @transform_5(%arg0: i32) -> (i32, i32) {
    %c0_i32 = arith.constant 0 : i32
    %c0_i32_0 = arith.constant 0 : i32
    return %arg0, %c0_i32 : i32, i32
  }
}

</mosaic_0001>

<bundles_post_ra>
// kernel: tpu_custom_call.1
= control target key start
LH: loop header
LB: loop body
LE: loop exit
PB: predicated region body
PF: predicated region fallthrough
CT: control target
= control target key end

     0   :  { %10 = vsyncpa [#allocation3], 0  ;;  %s651_s0 = inlined_call_operand.hbm [shape: f32[2,128], index: 0, kind: input, shape index: {}]   ;;  %s652_s1 = inlined_call_operand.hbm [shape: f32[128,128], index: 1, kind: input, shape index: {}]   ;;  %s653_s2 = inlined_call_operand.vmem [shape: f32[1,128], index: 2, kind: input, shape index: {}]   ;;  %s654_s3 = inlined_call_operand.hbm [shape: f32[128,128], index: 3, kind: input, shape index: {}]   ;;  %s655_s4 = inlined_call_operand.vmem [shape: f32[1,128], index: 4, kind: input, shape index: {}]   ;;  %s656_s5 = inlined_call_operand.hbm [shape: f32[2,128], index: 5, kind: output, shape index: {}]  }
   0x1   :  { %11 = vsyncpa [#allocation6], 0 }
   0x2   :  { %12 = vsyncpa [#allocation4], 0 }
   0x3   :  { %17 = vsyncadd [#allocation3], 96  ;;  %s528_s18 = smov [#allocation5]   ;;  %s434_s22 = scalar_lea.hbm %s652_s1, 2048 }
   0x4   :  { %s30_s19 = sshll.u32 %s528_s18, 4  ;;  %p435_p0 = scmp.ne.s32.totalorder %s652_s1, %s434_s22  ;;  %s31_s19 = int_to_ptr.vmem [resolvable:$true] %s30_s19 }
   0x5   :  { %p438_p1 = scmp.lt.u32.totalorder %s434_s22, %s652_s1 }
   0x7   :  { %p440_p2 = pnand %p438_p1, %p435_p0 }
   0x9   :  { %443 = shalt.err (!%p440_p2)
}
   0xa   :  { %s444_s27 = scalar_lea.vmem %s31_s19, 2048  ;;  %p449_p4 = scmp.lt.s32.totalorder %s31_s19, %s31_s19 }
   0xb   :  { %p445_p3 = scmp.ne.s32.totalorder %s31_s19, %s444_s27  ;;  %p450_p5 = scmp.lt.s32.totalorder %s444_s27, %s444_s27 }
   0xd   :  { %p451_p6 = por %p450_p5, %p449_p4 }
   0xf   :  { %p452_p7 = pnand %p451_p6, %p445_p3 }
  0x11   :  { %455 = shalt.err (!%p452_p7)
}
  0x12   :  { %s529_s28 = smov 128   ;;  %s530_s29 = smov 8  }
  0x13   :  { %36 = dma.hbm_to_vmem [thread:$0]  %s652_s1, 2048, %s31_s19, [#allocation6], %s529_s28, %s529_s28, %s530_s29  }
  0x14   :  { %s531_s7 = smov [#allocation2]   ;;  %s456_s11 = scalar_lea.hbm %s651_s0, 32 }
  0x15   :  { %s18_s8 = sshll.u32 %s531_s7, 4  ;;  %p457_p8 = scmp.ne.s32.totalorder %s651_s0, %s456_s11  ;;  %s19_s8 = int_to_ptr.vmem [resolvable:$true] %s18_s8 }
  0x16   :  { %p460_p9 = scmp.lt.u32.totalorder %s456_s11, %s651_s0 }
  0x18   :  { %p462_p10 = pnand %p460_p9, %p457_p8 }
  0x1a   :  { %465 = shalt.err (!%p462_p10)
}
  0x1b   :  { %s466_s16 = scalar_lea.vmem %s19_s8, 32  ;;  %s470_s1 = scalar_lea.vmem %s19_s8, 128 }
  0x1c   :  { %p467_p11 = scmp.ne.s32.totalorder %s19_s8, %s466_s16  ;;  %p471_p12 = scmp.lt.s32.totalorder %s19_s8, %s19_s8 }
  0x1d   :  { %p472_p13 = scmp.lt.s32.totalorder %s470_s1, %s466_s16 }
  0x1f   :  { %p473_p0 = por %p472_p13, %p471_p12 }
  0x21   :  { %p474_p1 = pnand %p473_p0, %p467_p11 }
  0x23   :  { %477 = shalt.err (!%p474_p1)
}
  0x24   :  { %s532_s17 = smov 32   ;;  %s533_s18 = smov 2  }
  0x25   :  { %24 = dma.hbm_to_vmem [thread:$0]  %s651_s0, 32, %s19_s8, [#allocation3], %s532_s17, %s532_s17, %s533_s18  }
  0x26   :  { %s534_s21 = smov [#allocation7]   ;;  %s478_s25 = scalar_lea.hbm %s654_s3, 2048 }
  0x27   :  { %s44_s22 = sshll.u32 %s534_s21, 4  ;;  %p479_p2 = scmp.ne.s32.totalorder %s654_s3, %s478_s25  ;;  %s45_s22 = int_to_ptr.vmem [resolvable:$true] %s44_s22 }
  0x28   :  { %p482_p3 = scmp.lt.u32.totalorder %s478_s25, %s654_s3 }
  0x2a   :  { %p484_p4 = pnand %p482_p3, %p479_p2 }
  0x2c   :  { %487 = shalt.err (!%p484_p4)
}
  0x2d   :  { %s488_s7 = scalar_lea.vmem %s45_s22, 2048  ;;  %p493_p6 = scmp.lt.s32.totalorder %s45_s22, %s45_s22 }
  0x2e   :  { %p489_p5 = scmp.ne.s32.totalorder %s45_s22, %s488_s7  ;;  %p494_p7 = scmp.lt.s32.totalorder %s488_s7, %s488_s7 }
  0x30   :  { %p495_p8 = por %p494_p7, %p493_p6 }
  0x32   :  { %p496_p9 = pnand %p495_p8, %p489_p5 }
  0x34   :  { %499 = shalt.err (!%p496_p9)
}
  0x35   :  { %50 = dma.hbm_to_vmem [thread:$0]  %s654_s3, 2048, %s45_s22, [#allocation6], %s529_s28, %s529_s28, %s530_s29  }
  0x36   :  { %522 = dma.done.wait [#allocation3], 128  }
  0x37   :  { %523 = vsyncadd [#allocation3], 4294967168 }
  0x38   :  { %524 = dma.done.wait [#allocation6], 4096  }
  0x39   :  { %525 = vsyncadd [#allocation6], 4294963200  ;;  %v535_v0 = vmov 0.0|0.0   ;;  %vm536_vm0 = vmmov 0   ;;  %v537_v1 = vmov 0.0   ;;  %v63_v2 = vld [vmem:[#allocation5] sm:$0xff] }
  0x3a   :  { %375 = vmatprep.subr.bf16.mxu0 %v535_v0  ;;  %337 = vmatprep.mubr.msk.f32.mxu0 %vm536_vm0, %v537_v1  ;;  %v64_v3 = vld [vmem:[#allocation5 + $0x8] sm:$0xff]  ;;  %v65_v4 = vld [vmem:[#allocation5 + $0x10] sm:$0xff]  ;;  %v66_v6 = vld [vmem:[#allocation5 + $0x18] sm:$0xff] }
  0x3b   :  { %399 = vmatprep.subr.bf16.mxu1 %v535_v0  ;;  %372 = vmatprep.mubr.msk.f32.mxu1 %vm536_vm0, %v537_v1  ;;  %v376_v5 = vpack.c.bf16 %v64_v3, %v63_v2  ;;  %v379_v7 = vpack.c.bf16 %v66_v6, %v65_v4  ;;  %v67_v8 = vld [vmem:[#allocation5 + $0x20] sm:$0xff]  ;;  %v68_v9 = vld [vmem:[#allocation5 + $0x28] sm:$0xff]  ;;  %v159_v12 = vld [vmem:[#allocation7 + $0x10] sm:$0xff] }
  0x3c   :  { %v157_v10 = vld [vmem:[#allocation7] sm:$0xff]  ;;  %v158_v11 = vld [vmem:[#allocation7 + $0x8] sm:$0xff]  ;;  %v160_v13 = vld [vmem:[#allocation7 + $0x18] sm:$0xff]  ;;  %v382_v14 = vpack.c.bf16 %v68_v9, %v67_v8 }
  0x3d   :  { %377 = vmatpush3.bf16.msra.mxu0 %v376_v5  ;;  %v400_v15 = vpack.c.bf16 %v158_v11, %v157_v10  ;;  %v69_v16 = vld [vmem:[#allocation5 + $0x30] sm:$0xff]  ;;  %v70_v17 = vld [vmem:[#allocation5 + $0x38] sm:$0xff]  ;;  %v403_v18 = vpack.c.bf16 %v160_v13, %v159_v12  ;;  %v161_v19 = vld [vmem:[#allocation7 + $0x20] sm:$0xff] }
  0x3e   :  { %378 = vmatprep.subr.bf16.mxu0 %v535_v0  ;;  %v162_v20 = vld [vmem:[#allocation7 + $0x28] sm:$0xff]  ;;  %v385_v21 = vpack.c.bf16 %v70_v17, %v69_v16  ;;  %v71_v22 = vld [vmem:[#allocation5 + $0x40] sm:$0xff]  ;;  %v163_v25 = vld [vmem:[#allocation7 + $0x30] sm:$0xff] }
  0x3f   :  { %401 = vmatpush3.bf16.msra.mxu1 %v400_v15  ;;  %v72_v23 = vld [vmem:[#allocation5 + $0x48] sm:$0xff]  ;;  %v406_v24 = vpack.c.bf16 %v162_v20, %v161_v19  ;;  %v164_v26 = vld [vmem:[#allocation7 + $0x38] sm:$0xff]  ;;  %v73_v28 = vld [vmem:[#allocation5 + $0x50] sm:$0xff] }
  0x40   :  { %402 = vmatprep.subr.bf16.mxu1 %v535_v0  ;;  %v388_v27 = vpack.c.bf16 %v72_v23, %v71_v22  ;;  %v74_v29 = vld [vmem:[#allocation5 + $0x58] sm:$0xff]  ;;  %v409_v30 = vpack.c.bf16 %v164_v26, %v163_v25  ;;  %v165_v31 = vld [vmem:[#allocation7 + $0x40] sm:$0xff]  ;;  %v166_v32 = vld [vmem:[#allocation7 + $0x48] sm:$0xff] }
  0x41   :  { %380 = vmatpush3.bf16.msra.mxu0 %v379_v7  ;;  %v391_v33 = vpack.c.bf16 %v74_v29, %v73_v28  ;;  %v75_v34 = vld [vmem:[#allocation5 + $0x60] sm:$0xff]  ;;  %v76_v35 = vld [vmem:[#allocation5 + $0x68] sm:$0xff]  ;;  %v412_v36 = vpack.c.bf16 %v166_v32, %v165_v31  ;;  %v167_v37 = vld [vmem:[#allocation7 + $0x50] sm:$0xff] }
  0x42   :  { %381 = vmatprep.subr.bf16.mxu0 %v535_v0  ;;  %v168_v38 = vld [vmem:[#allocation7 + $0x58] sm:$0xff]  ;;  %v394_v39 = vpack.c.bf16 %v76_v35, %v75_v34  ;;  %v77_v40 = vld [vmem:[#allocation5 + $0x70] sm:$0xff]  ;;  %v169_v43 = vld [vmem:[#allocation7 + $0x60] sm:$0xff] }
  0x43   :  { %404 = vmatpush3.bf16.msra.mxu1 %v403_v18  ;;  %v78_v41 = vld [vmem:[#allocation5 + $0x78] sm:$0xff]  ;;  %v415_v42 = vpack.c.bf16 %v168_v38, %v167_v37  ;;  %v170_v44 = vld [vmem:[#allocation7 + $0x68] sm:$0xff]  ;;  %v171_v48 = vld [vmem:[#allocation7 + $0x70] sm:$0xff] }
  0x44   :  { %405 = vmatprep.subr.bf16.mxu1 %v535_v0  ;;  %v397_v45 = vpack.c.bf16 %v78_v41, %v77_v40  ;;  %v418_v46 = vpack.c.bf16 %v170_v44, %v169_v43  ;;  %v62_v47 = vld [vmem:[#allocation2] sm:$0xff] }
  0x45   :  { %383 = vmatpush3.bf16.msra.mxu0 %v382_v14  ;;  %v172_v49 = vld [vmem:[#allocation7 + $0x78] sm:$0xff] }
  0x46   :  { %384 = vmatprep.subr.bf16.mxu0 %v535_v0  ;;  %v421_v50 = vpack.c.bf16 %v172_v49, %v171_v48  ;;  %v269_v51 = vld [vmem:[%s653_s2] ss:$0 sm:$0xff] }
  0x47   :  { %407 = vmatpush3.bf16.msra.mxu1 %v406_v24  ;;  %v270_v56 = vld [vmem:[%s655_s4] ss:$0 sm:$0xff] }
  0x48   :  { %408 = vmatprep.subr.bf16.mxu1 %v535_v0 }
  0x49   :  { %386 = vmatpush3.bf16.msra.mxu0 %v385_v21 }
  0x4a   :  { %387 = vmatprep.subr.bf16.mxu0 %v535_v0 }
  0x4b   :  { %410 = vmatpush3.bf16.msra.mxu1 %v409_v30 }
  0x4c   :  { %411 = vmatprep.subr.bf16.mxu1 %v535_v0 }
  0x4d   :  { %389 = vmatpush3.bf16.msra.mxu0 %v388_v27 }
  0x4e   :  { %390 = vmatprep.subr.bf16.mxu0 %v535_v0 }
  0x4f   :  { %413 = vmatpush3.bf16.msra.mxu1 %v412_v36 }
  0x50   :  { %414 = vmatprep.subr.bf16.mxu1 %v535_v0 }
  0x51   :  { %392 = vmatpush3.bf16.msra.mxu0 %v391_v33 }
  0x52   :  { %393 = vmatprep.subr.bf16.mxu0 %v535_v0 }
  0x53   :  { %416 = vmatpush3.bf16.msra.mxu1 %v415_v42 }
  0x54   :  { %417 = vmatprep.subr.bf16.mxu1 %v535_v0 }
  0x55   :  { %395 = vmatpush3.bf16.msra.mxu0 %v394_v39 }
  0x56   :  { %396 = vmatprep.subr.bf16.mxu0 %v535_v0 }
  0x57   :  { %419 = vmatpush3.bf16.msra.mxu1 %v418_v46 }
  0x58   :  { %420 = vmatprep.subr.bf16.mxu1 %v535_v0 }
  0x59   :  { %398 = vmatpush3.bf16.msra.mxu0 %v397_v45 }
  0x5b   :  { %422 = vmatpush3.bf16.msra.mxu1 %v421_v50 }
  0x5c   :  { %338 = vmatmul.mubr.f32.vlgmr.msra.gmra.mrb[0].mxu0 %v62_v47 }
 0x12f   :  { %v152_v52 = vpop.f32.mrb[0].mxu0 }
 0x130   :  { %v153_v53 = vadd.f32 %v269_v51, %v152_v52  ;;  %v339_v54 = vpop.f32.mrb[1].mxu0 }
 0x132   :  { %v156_v55 = vmax.f32 %v153_v53, 0.0 }
 0x134   :  { %373 = vmatmul.mubr.f32.vlgmr.msra.gmra.mrb[0].mxu1 %v156_v55 }
 0x207   :  { %v246_v57 = vpop.f32.mrb[0].mxu1 }
 0x208   :  { %v247_v58 = vadd.f32 %v270_v56, %v246_v57  ;;  %v374_v59 = vpop.f32.mrb[1].mxu1 }
 0x20a   :  { %250 = vst [vmem:[#allocation8] sm:$0xff] %v247_v58 }
 0x20b   :  { %255 = vsyncadd [#allocation4], 96  ;;  %s538_s10 = smov [#allocation8]  }
 0x20c   :  { %s256_s11 = sshll.u32 %s538_s10, 4  ;;  %s257_s11 = int_to_ptr.vmem [resolvable:$true] %s256_s11 }
 0x20d   :  { %s500_s12 = scalar_lea.vmem %s257_s11, 32  ;;  %s504_s2 = scalar_lea.vmem %s257_s11, 128 }
 0x20e   :  { %p501_p10 = scmp.ne.s32.totalorder %s257_s11, %s500_s12  ;;  %p505_p11 = scmp.lt.s32.totalorder %s257_s11, %s257_s11 }
 0x20f   :  { %p506_p12 = scmp.lt.s32.totalorder %s504_s2, %s500_s12 }
 0x211   :  { %p507_p13 = por %p506_p12, %p505_p11 }
 0x213   :  { %p508_p0 = pnand %p507_p13, %p501_p10 }
 0x215   :  { %511 = shalt.err (!%p508_p0)
}
 0x216   :  { %s512_s4 = scalar_lea.hbm %s656_s5, 32 }
 0x217   :  { %p513_p1 = scmp.ne.s32.totalorder %s656_s5, %s512_s4  ;;  %p516_p2 = scmp.lt.u32.totalorder %s512_s4, %s656_s5 }
 0x219   :  { %p518_p3 = pnand %p516_p2, %p513_p1 }
 0x21b   :  { %521 = shalt.err (!%p518_p3)
}
 0x21c   :  { %262 = dma.vmem_to_hbm [thread:$0]  %s257_s11, 32, %s656_s5, [#allocation4], %s532_s17, %s532_s17, %s533_s18  }
 0x21d   :  { %526 = dma.done.wait [#allocation4], 128  }
 0x21e   :  { %527 = vsyncadd [#allocation4], 4294967168 }
 0x21f   :  { %266 = vsyncpa [#allocation3], 1 }
 0x220   :  { %267 = vsyncpa [#allocation6], 1 }
 0x221   :  { %268 = vsyncpa [#allocation4], 1 }

</bundles_post_ra>
